<compile_context>
chip_gen: v7x
topology: tpu7x:2x2x1
jax: 0.10.0
libtpu: 0.0.40
codegen_flags: <defaults>
</compile_context>

<pallas_src>
import functools

import jax
import jax.numpy as jnp
from jax.experimental import pallas as pl
from jax.experimental.pallas import tpu as pltpu


def _ceil_to(x: int, m: int) -> int:
    return ((x + m - 1) // m) * m


def _graph_conv_kernel(x0_ref, sup_ref, wsk_ref, init_ref, out_ref, x0c_ref,
                       *, batch, in_dim, max_step):
    """One grid step = ALL max_step Chebyshev hops of one support, fused with
    the matching slices of the output linear layer.

    Shapes (Np = node axis padded to a multiple of 128):
      x0_ref   : (B*D, Np)   f32  initial diffusion state, nodes on lanes
      sup_ref  : (1, Np, Np)      current support, pre-transposed (hop = x @ sup)
      wsk_ref  : (1, K, O, D) f32 weight slices of this support's K metrics
      init_ref : (B, O, Np)  f32  bias + metric-0 contribution (precomputed)
      out_ref  : (B, O, Np)  f32  VMEM-resident accumulator (transposed output)
      x0c_ref  : (B*D, Np)   f32  VMEM scratch -- x0 carry across supports
    """
    si = pl.program_id(0)

    @pl.when(si == 0)
    def _seed():
        out_ref[...] = init_ref[...]
        x0c_ref[...] = x0_ref[...]

    sup_t = sup_ref[0]                        # (Np, Np), f32 or bf16
    n_lanes = sup_t.shape[-1]

    def contribute(xm, kk):
        # out[b, o, :] += W_k[o, d] * xm[b*D + d, :]  -- one batched matmul,
        # one accumulator read-modify-write (no per-batch Python loop).
        wm = wsk_ref[0, kk]                                   # (O, D) f32
        x3 = xm.reshape(batch, in_dim, n_lanes)               # (B, D, Np)
        wb = jnp.broadcast_to(wm, (batch,) + wm.shape)        # (B, O, D)
        out_ref[...] += jnp.einsum(
            "bod,bdn->bon", wb, x3, preferred_element_type=jnp.float32)

    # Hop 1:  x1 = support @ x0.  NOTE: x0 carries over from the previous
    # support -- the reference PyTorch recurrence intentionally never reseeds
    # it, which is why the support grid axis must stay sequential.
    x0v = x0c_ref[...]                                        # (B*D, Np) f32
    x1v = jnp.dot(x0v.astype(sup_t.dtype), sup_t,
                  preferred_element_type=jnp.float32)
    contribute(x1v, 0)

    # Hops 2..K: Chebyshev recurrence x2 = 2 * support @ x1 - x0.
    for kk in range(1, max_step):
        x2v = 2.0 * jnp.dot(x1v.astype(sup_t.dtype), sup_t,
                            preferred_element_type=jnp.float32) - x0v
        contribute(x2v, kk)
        x0v, x1v = x1v, x2v

    # Carry x0 to the next support (x1 is rebuilt there).
    x0c_ref[...] = x0v


def graph_conv_forward(inputs, supports, weight, bias, max_step,
                       support_dtype=jnp.bfloat16):
    """inputs: (B, N, D) f32, supports: (S, N, N) f32,
       weight: (D * num_metrics, O) f32 (pre-transposed nn.Linear weight),
       bias: (O,) f32.  Returns (B, N, O) f32."""
    b, n, d = inputs.shape
    s = supports.shape[0]
    out_dim = weight.shape[1]
    num_metrics = max_step * s + 1
    assert weight.shape[0] == d * num_metrics

    if max_step == 0 or s == 0:
        # Only metric 0 (the raw input): a tiny dense layer, left to XLA.
        return jnp.dot(inputs, weight) + bias

    # ---- layout plumbing (small tensors, done once in XLA) ------------------
    n_pad = _ceil_to(n, 128)                                   # lane-dense nodes
    x0_3d = jnp.transpose(inputs, (0, 2, 1))                   # (B, D, N)
    x0 = x0_3d.reshape(b * d, n)                               # row = b*D + d
    x0 = jnp.pad(x0, ((0, 0), (0, n_pad - n)))

    supports_t = jnp.transpose(supports, (0, 2, 1))            # hop = x @ S^T
    supports_t = jnp.pad(supports_t,
                         ((0, 0), (0, n_pad - n), (0, n_pad - n)))
    supports_t = supports_t.astype(support_dtype)

    # Per-metric weight slices: metric m uses rows weight[d*M + m] (stride M).
    w_full = jnp.transpose(
        weight.reshape(d, num_metrics, out_dim), (1, 2, 0))    # (M, O, D)
    w0 = w_full[0]                                             # (O, D)
    w_sk = w_full[1:].reshape(s, max_step, out_dim, d)         # (S, K, O, D)

    # Init term = bias + metric-0 contribution (precomputed, fetched once).
    init = jnp.einsum("od,bdn->bon", w0, x0_3d,
                      preferred_element_type=jnp.float32,
                      precision=jax.lax.Precision.HIGHEST)
    init = init + bias[None, :, None]                          # (B, O, N)
    init = jnp.pad(init, ((0, 0), (0, 0), (0, n_pad - n)))

    # ---- generation-aware VMEM budget ((8,128)-padding aware) ---------------
    sup_itemsize = jnp.dtype(support_dtype).itemsize
    bd_pad = _ceil_to(b * d, 8)
    o_pad = _ceil_to(out_dim, 8)
    need = (2 * n_pad * n_pad * sup_itemsize                   # support stream x2 buf
            + 2 * max_step * o_pad * _ceil_to(d, 128) * 4      # weight slab stream
            + 2 * bd_pad * n_pad * 4                           # x0 input
            + 2 * b * o_pad * n_pad * 4                        # init input
            + 2 * b * o_pad * n_pad * 4                        # output accumulator
            + bd_pad * n_pad * 4)                              # x0 carry scratch
    try:
        vmem_cap = int(pltpu.get_tpu_info().vmem_capacity_bytes)
    except Exception:                                          # pragma: no cover
        vmem_cap = 64 * 1024 * 1024                            # v7x-safe fallback
    vmem_limit = int(min(vmem_cap - (2 << 20),
                         max(need + (4 << 20), 32 << 20)))

    kernel = functools.partial(_graph_conv_kernel,
                               batch=b, in_dim=d, max_step=max_step)

    out_t = pl.pallas_call(
        kernel,
        out_shape=jax.ShapeDtypeStruct((b, out_dim, n_pad), jnp.float32),
        grid_spec=pltpu.PrefetchScalarGridSpec(
            num_scalar_prefetch=0,
            grid=(s,),
            in_specs=[
                # initial diffusion state: fetched once, resident
                pl.BlockSpec((b * d, n_pad), lambda si: (0, 0)),
                # one transposed support per step (streamed, double-buffered)
                pl.BlockSpec((1, n_pad, n_pad), lambda si: (si, 0, 0)),
                # the K weight slices of this support's metrics (streamed)
                pl.BlockSpec((1, max_step, out_dim, d),
                             lambda si: (si, 0, 0, 0)),
                # precomputed bias + metric-0 term (fetched once, resident)
                pl.BlockSpec((b, out_dim, n_pad), lambda si: (0, 0, 0)),
            ],
            # Constant block index => accumulator stays resident in VMEM and is
            # written back to HBM once, after the final grid step.
            out_specs=pl.BlockSpec((b, out_dim, n_pad), lambda si: (0, 0, 0)),
            scratch_shapes=[
                pltpu.VMEM((b * d, n_pad), jnp.float32),       # x0 carry
            ],
        ),
        compiler_params=pltpu.CompilerParams(
            dimension_semantics=("arbitrary",),  # carried recurrence -> sequential
            vmem_limit_bytes=vmem_limit,
        ),
    )(x0, supports_t, w_sk, init)

    # (B, O, Np) -> (B, N, O): slice node padding, tiny transpose back in XLA.
    return jnp.transpose(out_t[:, :, :n], (0, 2, 1))


def reference_forward(inputs, supports, weight, bias, max_step):
    """Pure-JAX transcription of the PyTorch forward, for verification."""
    b, n, d = inputs.shape
    hi = jax.lax.Precision.HIGHEST
    x0 = jnp.transpose(inputs, (1, 2, 0)).reshape(n, -1)
    x = x0[None]
    if max_step != 0:
        for si in range(supports.shape[0]):
            sup = supports[si]
            x1 = jnp.dot(sup, x0, precision=hi)
            x = jnp.concatenate([x, x1[None]], axis=0)
            for _k in range(2, max_step + 1):
                x2 = 2.0 * jnp.dot(sup, x1, precision=hi) - x0
                x = jnp.concatenate([x, x2[None]], axis=0)
                x1, x0 = x2, x1
    m = x.shape[0]
    x = jnp.transpose(x.reshape(m, n, d, b), (3, 1, 2, 0)).reshape(b, n, -1)
    return jnp.dot(x, weight, precision=hi) + bias


if __name__ == "__main__":
    # Small shapes consistent with the module.
    B, N, D = 2, 16, 4          # batch, num_nodes, input_dim
    S, K = 2, 2                 # n_supports, max_step
    OUT_DIM = 32
    NUM_METRICS = K * S + 1     # = 5
    FEAT = D * NUM_METRICS      # = 20

    key = jax.random.PRNGKey(0)
    k_in, k_sup, k_w, k_b = jax.random.split(key, 4)

    inputs = jax.random.normal(k_in, (B, N, D), dtype=jnp.float32)

    # Row-normalized random supports (diffusion-matrix-like), deterministic.
    raw = jax.random.uniform(k_sup, (S, N, N), dtype=jnp.float32)
    supports = raw / jnp.sum(raw, axis=-1, keepdims=True)

    # Deterministic nn.Linear(FEAT, OUT_DIM)-shaped parameters (stored transposed).
    bound = 1.0 / (FEAT ** 0.5)
    weight = jax.random.uniform(
        k_w, (FEAT, OUT_DIM), dtype=jnp.float32, minval=-bound, maxval=bound)
    bias = jax.random.uniform(
        k_b, (OUT_DIM,), dtype=jnp.float32, minval=-bound, maxval=bound)

    fwd = jax.jit(graph_conv_forward,
                  static_argnames=("max_step", "support_dtype"))

    ref = jax.block_until_ready(
        reference_forward(inputs, supports, weight, bias, K))

    # f32 support stream: tight check (catches layout / recurrence bugs).
    out_f32 = jax.block_until_ready(
        fwd(inputs, supports, weight, bias, max_step=K,
            support_dtype=jnp.float32))
    assert out_f32.shape == (B, N, OUT_DIM), out_f32.shape
    assert jnp.allclose(out_f32, ref, rtol=2e-4, atol=2e-4), float(
        jnp.max(jnp.abs(out_f32 - ref)))

    # bf16 support stream (default / bandwidth-optimized path): loose check.
    out_bf16 = jax.block_until_ready(
        fwd(inputs, supports, weight, bias, max_step=K,
            support_dtype=jnp.bfloat16))
    assert out_bf16.shape == (B, N, OUT_DIM), out_bf16.shape
    assert jnp.allclose(out_bf16, ref, rtol=2e-2, atol=2e-2), float(
        jnp.max(jnp.abs(out_bf16 - ref)))

    print("KERNEL_OK")
</pallas_src>

<mosaic_0001>
module attributes {stable_mosaic.version = 11 : i64} {
  func.func @_graph_conv_kernel(%arg0: i32, %arg1: memref<8x128xf32, #tpu.memory_space<vmem>>, %arg2: memref<1x128x128xf32, #tpu.memory_space<vmem>>, %arg3: memref<1x2x32x4xf32, #tpu.memory_space<vmem>>, %arg4: memref<2x32x128xf32, #tpu.memory_space<vmem>>, %arg5: memref<2x32x128xf32, #tpu.memory_space<vmem>>, %arg6: memref<8x128xf32, #tpu.memory_space<vmem>>) attributes {dimension_semantics = [#tpu.dimension_semantics<arbitrary>], iteration_bounds = array<i64: 2>, scalar_prefetch = 0 : i64, scratch_operands = 1 : i64, tpu.core_type = #tpu.core_type<tc>, window_params = [{pipeline_mode = #tpu.pipeline_mode<synchronous>, transform_indices = @transform_0, window_bounds = array<i64: 8, 128>}, {transform_indices = @transform_1, window_bounds = array<i64: 1, 128, 128>}, {transform_indices = @transform_2, window_bounds = array<i64: 1, 2, 32, 4>}, {pipeline_mode = #tpu.pipeline_mode<synchronous>, transform_indices = @transform_3, window_bounds = array<i64: 2, 32, 128>}, {pipeline_mode = #tpu.pipeline_mode<synchronous>, transform_indices = @transform_4, window_bounds = array<i64: 2, 32, 128>}]} {
    %c0_i32 = arith.constant 0 : i32
    %0 = arith.cmpi eq, %arg0, %c0_i32 : i32
    %1 = arith.extui %0 : i1 to i32
    %c0_i32_0 = arith.constant 0 : i32
    %2 = arith.cmpi ne, %1, %c0_i32_0 : i32
    scf.if %2 {
      %c0_30 = arith.constant 0 : index
      %c0_31 = arith.constant 0 : index
      %c0_32 = arith.constant 0 : index
      %30 = vector.load %arg4[%c0_30, %c0_31, %c0_32] : memref<2x32x128xf32, #tpu.memory_space<vmem>>, vector<2x32x128xf32>
      %c0_33 = arith.constant 0 : index
      %c0_34 = arith.constant 0 : index
      %c0_35 = arith.constant 0 : index
      %31 = vector.load %arg5[%c0_33, %c0_34, %c0_35] : memref<2x32x128xf32, #tpu.memory_space<vmem>>, vector<2x32x128xf32>
      tpu.vector_store %arg5[%c0_33, %c0_34, %c0_35], %30 {strides = array<i32>} : memref<2x32x128xf32, #tpu.memory_space<vmem>>, vector<2x32x128xf32>,
      %c0_36 = arith.constant 0 : index
      %c0_37 = arith.constant 0 : index
      %32 = vector.load %arg1[%c0_36, %c0_37] : memref<8x128xf32, #tpu.memory_space<vmem>>, vector<8x128xf32>
      %c0_38 = arith.constant 0 : index
      %c0_39 = arith.constant 0 : index
      %33 = vector.load %arg6[%c0_38, %c0_39] : memref<8x128xf32, #tpu.memory_space<vmem>>, vector<8x128xf32>
      tpu.vector_store %arg6[%c0_38, %c0_39], %32 {strides = array<i32>} : memref<8x128xf32, #tpu.memory_space<vmem>>, vector<8x128xf32>,
    } else {
    }
    %c0 = arith.constant 0 : index
    %c0_1 = arith.constant 0 : index
    %c0_2 = arith.constant 0 : index
    %3 = vector.load %arg2[%c0, %c0_1, %c0_2] : memref<1x128x128xf32, #tpu.memory_space<vmem>>, vector<1x128x128xf32>
    %4 = vector.shape_cast %3 : vector<1x128x128xf32> to vector<128x128xf32>
    %c0_3 = arith.constant 0 : index
    %c0_4 = arith.constant 0 : index
    %5 = vector.load %arg6[%c0_3, %c0_4] : memref<8x128xf32, #tpu.memory_space<vmem>>, vector<8x128xf32>
    %cst = arith.constant dense<0.000000e+00> : vector<8x128xf32>
    %6 = tpu.matmul %5, %4, %cst {dimension_numbers = #tpu.dot_dimension_numbers<[1], [0], [0], [1], [0, 0, 1, 1], [], []>} : vector<8x128xf32>, vector<128x128xf32>, vector<8x128xf32> -> vector<8x128xf32>
    %c0_5 = arith.constant 0 : index
    %c0_6 = arith.constant 0 : index
    %c0_7 = arith.constant 0 : index
    %c0_8 = arith.constant 0 : index
    %7 = vector.load %arg3[%c0_5, %c0_6, %c0_7, %c0_8] : memref<1x2x32x4xf32, #tpu.memory_space<vmem>>, vector<1x1x32x4xf32>
    %8 = vector.shape_cast %7 : vector<1x1x32x4xf32> to vector<32x4xf32>
    %9 = vector.shape_cast %6 : vector<8x128xf32> to vector<2x4x128xf32>
    %10 = vector.shape_cast %8 : vector<32x4xf32> to vector<1x32x4xf32>
    %11 = vector.broadcast %10 : vector<1x32x4xf32> to vector<2x32x4xf32>
    %c0_9 = arith.constant 0 : index
    %c0_10 = arith.constant 0 : index
    %c0_11 = arith.constant 0 : index
    %12 = vector.load %arg5[%c0_9, %c0_10, %c0_11] : memref<2x32x128xf32, #tpu.memory_space<vmem>>, vector<2x32x128xf32>
    "tpu.trace_start"() <{level = 10 : i32, message = "bod,bdn->bon"}> : () -> ()
    %cst_12 = arith.constant dense<0.000000e+00> : vector<2x32x128xf32>
    %13 = tpu.matmul %11, %9, %cst_12 {dimension_numbers = #tpu.dot_dimension_numbers<[2], [1], [1], [2], [0, 0, 0, 1, 1, 2], [0], [0]>} : vector<2x32x4xf32>, vector<2x4x128xf32>, vector<2x32x128xf32> -> vector<2x32x128xf32>
    "tpu.trace_stop"() : () -> ()
    %14 = arith.addf %12, %13 : vector<2x32x128xf32>
    %c0_13 = arith.constant 0 : index
    %c0_14 = arith.constant 0 : index
    %c0_15 = arith.constant 0 : index
    %15 = vector.load %arg5[%c0_13, %c0_14, %c0_15] : memref<2x32x128xf32, #tpu.memory_space<vmem>>, vector<2x32x128xf32>
    tpu.vector_store %arg5[%c0_13, %c0_14, %c0_15], %14 {strides = array<i32>} : memref<2x32x128xf32, #tpu.memory_space<vmem>>, vector<2x32x128xf32>,
    %cst_16 = arith.constant dense<0.000000e+00> : vector<8x128xf32>
    %16 = tpu.matmul %6, %4, %cst_16 {dimension_numbers = #tpu.dot_dimension_numbers<[1], [0], [0], [1], [0, 0, 1, 1], [], []>} : vector<8x128xf32>, vector<128x128xf32>, vector<8x128xf32> -> vector<8x128xf32>
    %cst_17 = arith.constant 2.000000e+00 : f32
    %17 = vector.broadcast %cst_17 : f32 to vector<8x128xf32>
    %18 = arith.mulf %17, %16 : vector<8x128xf32>
    %19 = arith.subf %18, %5 : vector<8x128xf32>
    %c0_18 = arith.constant 0 : index
    %c1 = arith.constant 1 : index
    %c0_19 = arith.constant 0 : index
    %c0_20 = arith.constant 0 : index
    %20 = vector.load %arg3[%c0_18, %c1, %c0_19, %c0_20] : memref<1x2x32x4xf32, #tpu.memory_space<vmem>>, vector<1x1x32x4xf32>
    %21 = vector.shape_cast %20 : vector<1x1x32x4xf32> to vector<32x4xf32>
    %22 = vector.shape_cast %19 : vector<8x128xf32> to vector<2x4x128xf32>
    %23 = vector.shape_cast %21 : vector<32x4xf32> to vector<1x32x4xf32>
    %24 = vector.broadcast %23 : vector<1x32x4xf32> to vector<2x32x4xf32>
    %c0_21 = arith.constant 0 : index
    %c0_22 = arith.constant 0 : index
    %c0_23 = arith.constant 0 : index
    %25 = vector.load %arg5[%c0_21, %c0_22, %c0_23] : memref<2x32x128xf32, #tpu.memory_space<vmem>>, vector<2x32x128xf32>
    "tpu.trace_start"() <{level = 10 : i32, message = "bod,bdn->bon"}> : () -> ()
    %cst_24 = arith.constant dense<0.000000e+00> : vector<2x32x128xf32>
    %26 = tpu.matmul %24, %22, %cst_24 {dimension_numbers = #tpu.dot_dimension_numbers<[2], [1], [1], [2], [0, 0, 0, 1, 1, 2], [0], [0]>} : vector<2x32x4xf32>, vector<2x4x128xf32>, vector<2x32x128xf32> -> vector<2x32x128xf32>
    "tpu.trace_stop"() : () -> ()
    %27 = arith.addf %25, %26 : vector<2x32x128xf32>
    %c0_25 = arith.constant 0 : index
    %c0_26 = arith.constant 0 : index
    %c0_27 = arith.constant 0 : index
    %28 = vector.load %arg5[%c0_25, %c0_26, %c0_27] : memref<2x32x128xf32, #tpu.memory_space<vmem>>, vector<2x32x128xf32>
    tpu.vector_store %arg5[%c0_25, %c0_26, %c0_27], %27 {strides = array<i32>} : memref<2x32x128xf32, #tpu.memory_space<vmem>>, vector<2x32x128xf32>,
    %c0_28 = arith.constant 0 : index
    %c0_29 = arith.constant 0 : index
    %29 = vector.load %arg6[%c0_28, %c0_29] : memref<8x128xf32, #tpu.memory_space<vmem>>, vector<8x128xf32>
    tpu.vector_store %arg6[%c0_28, %c0_29], %6 {strides = array<i32>} : memref<8x128xf32, #tpu.memory_space<vmem>>, vector<8x128xf32>,
    return
  }
  func.func @transform_0(%arg0: i32) -> (i32, i32) {
    %c0_i32 = arith.constant 0 : i32
    %c0_i32_0 = arith.constant 0 : i32
    %c0_i32_1 = arith.constant 0 : i32
    return %c0_i32, %c0_i32_0 : i32, i32
  }
  func.func @transform_1(%arg0: i32) -> (i32, i32, i32) {
    %c0_i32 = arith.constant 0 : i32
    %c0_i32_0 = arith.constant 0 : i32
    %c0_i32_1 = arith.constant 0 : i32
    return %arg0, %c0_i32, %c0_i32_0 : i32, i32, i32
  }
  func.func @transform_2(%arg0: i32) -> (i32, i32, i32, i32) {
    %c0_i32 = arith.constant 0 : i32
    %c0_i32_0 = arith.constant 0 : i32
    %c0_i32_1 = arith.constant 0 : i32
    %c0_i32_2 = arith.constant 0 : i32
    return %arg0, %c0_i32, %c0_i32_0, %c0_i32_1 : i32, i32, i32, i32
  }
  func.func @transform_3(%arg0: i32) -> (i32, i32, i32) {
    %c0_i32 = arith.constant 0 : i32
    %c0_i32_0 = arith.constant 0 : i32
    %c0_i32_1 = arith.constant 0 : i32
    %c0_i32_2 = arith.constant 0 : i32
    return %c0_i32, %c0_i32_0, %c0_i32_1 : i32, i32, i32
  }
  func.func @transform_4(%arg0: i32) -> (i32, i32, i32) {
    %c0_i32 = arith.constant 0 : i32
    %c0_i32_0 = arith.constant 0 : i32
    %c0_i32_1 = arith.constant 0 : i32
    %c0_i32_2 = arith.constant 0 : i32
    return %c0_i32, %c0_i32_0, %c0_i32_1 : i32, i32, i32
  }
}

</mosaic_0001>

<bundles_post_ra>
// kernel: graph_conv_forward.1
= control target key start
LH: loop header
LB: loop body
LE: loop exit
PB: predicated region body
PF: predicated region fallthrough
CT: control target
= control target key end

     0   :  { %s1182_s15 = smov 0   ;;  %s1372_s0 = inlined_call_operand.vmem [shape: f32[8,128], index: 0, kind: input, shape index: {}]   ;;  %s1373_s1 = inlined_call_operand.vmem [shape: f32[2,128,128], index: 1, kind: input, shape index: {}]   ;;  %s1374_s2 = inlined_call_operand.vmem [shape: f32[2,2,32,4], index: 2, kind: input, shape index: {}]   ;;  %s1375_s3 = inlined_call_operand.vmem [shape: f32[2,32,128], index: 3, kind: input, shape index: {}]   ;;  %s1376_s4 = inlined_call_operand.vmem [shape: f32[2,32,128], index: 4, kind: output, shape index: {}]  }
   0x1 LB: > { %s860_s16 = sadd.s32 4294967295, %s1152_s15   ;;  %p863_p0 = scmp.ge.s32.totalorder %s1152_s15, 1  ;;  %s1152_s15 = sphi %s1182_s15, %s14_s15  }
   0x2   : > { %p167_p1 = scmp.lt.s32.totalorder %s1152_s15, 3 }
   0x4   : > { %p168_p2 = pnand %p863_p0, %p167_p1 }
   0x5   : > { %p193_p3 = scmp.lt.s32.totalorder (!%p168_p2), %s860_s16, 1  ;;  %p868_p4 = scmp.ne.s32.totalorder (!%p168_p2), %s860_s16, 0 }
   0x6   : > { %171 = sbr.rel (%p168_p2) target bundleno = 745 (0x2e9), region = 36 }
   0xd   : > { %s194_s17 = scalar_select %p193_p3, %s860_s16, 1 }
   0xe   : > { %206 = sbr.rel (%p868_p4) target bundleno = 21 (0x15), region = 40  ;;  %v207_v0 = vld [vmem:[%s1375_s3] sm:$0xff] (!%p868_p4)  ;;  %v208_v1 = vld [vmem:[%s1375_s3 + $0x8] sm:$0xff] (!%p868_p4)  ;;  %v209_v2 = vld [vmem:[%s1375_s3 + $0x10] sm:$0xff] (!%p868_p4) }
   0xf   : > { %s895_s18 = sshll.u32 %s194_s17, 7  ;;  %s896_s19 = sshll.u32 %s194_s17, 6  ;;  %215 = vst [vmem:[%s1376_s4] sm:$0xff] (!%p868_p4), %v207_v0  ;;  %216 = vst [vmem:[%s1376_s4 + $0x8] sm:$0xff] (!%p868_p4), %v208_v1  ;;  %v210_v3 = vld [vmem:[%s1375_s3 + $0x18] sm:$0xff] (!%p868_p4)  ;;  %v211_v4 = vld [vmem:[%s1375_s3 + $0x20] sm:$0xff] (!%p868_p4) }
  0x10   : > { %s1193_s22 = scalar_lea.vmem %s1373_s1, %s895_s18  ;;  %s1198_s25 = scalar_lea.vmem %s1374_s2, %s896_s19  ;;  %217 = vst [vmem:[%s1376_s4 + $0x10] sm:$0xff] (!%p868_p4), %v209_v2  ;;  %v212_v5 = vld [vmem:[%s1375_s3 + $0x28] sm:$0xff] (!%p868_p4)  ;;  %218 = vst [vmem:[%s1376_s4 + $0x18] sm:$0xff] (!%p868_p4), %v210_v3  ;;  %v213_v6 = vld [vmem:[%s1375_s3 + $0x30] sm:$0xff] (!%p868_p4) }
  0x11   : > { %219 = vst [vmem:[%s1376_s4 + $0x20] sm:$0xff] (!%p868_p4), %v211_v4  ;;  %220 = vst [vmem:[%s1376_s4 + $0x28] sm:$0xff] (!%p868_p4), %v212_v5  ;;  %v214_v7 = vld [vmem:[%s1375_s3 + $0x38] sm:$0xff] (!%p868_p4)  ;;  %v223_v8 = vld [vmem:[%s1372_s0] sm:$0xff] (!%p868_p4) }
  0x12   : > { %221 = vst [vmem:[%s1376_s4 + $0x30] sm:$0xff] (!%p868_p4), %v213_v6  ;;  %222 = vst [vmem:[%s1376_s4 + $0x38] sm:$0xff] (!%p868_p4), %v214_v7 }
  0x13   : > { %224 = vst [vmem:[#allocation2] sm:$0xff] (!%p868_p4), %v223_v8 }
  0x15 PF: > { %v225_v9 = vld [vmem:[%s1193_s22] sm:$0xff]  ;;  %v226_v10 = vld [vmem:[%s1193_s22 + $0x8] sm:$0xff]  ;;  %v227_v11 = vld [vmem:[%s1193_s22 + $0x10] sm:$0xff]  ;;  %v1154_v12 = vmov 0.0|0.0   ;;  %vm1155_vm0 = vmmov 0   ;;  %v1156_v15 = vmov 0.0  }
  0x16   : > { %1053 = vmatprep.subr.bf16.mxu0 %v1154_v12  ;;  %v1054_v13 = vpack.c.bf16 %v226_v10, %v225_v9  ;;  %v228_v14 = vld [vmem:[%s1193_s22 + $0x18] sm:$0xff]  ;;  %983 = vmatprep.mubr.msk.f32.mxu0 %vm1155_vm0, %v1156_v15  ;;  %v229_v17 = vld [vmem:[%s1193_s22 + $0x20] sm:$0xff]  ;;  %v230_v18 = vld [vmem:[%s1193_s22 + $0x28] sm:$0xff]  ;;  %vm326_vm1 = vcmask 31744   ;;  %vm339_vm2 = vcmask 1043456  }
  0x17   : > { %v1057_v16 = vpack.c.bf16 %v228_v14, %v227_v11  ;;  %v1060_v19 = vpack.c.bf16 %v230_v18, %v229_v17  ;;  %v231_v20 = vld [vmem:[%s1193_s22 + $0x30] sm:$0xff]  ;;  %v232_v21 = vld [vmem:[%s1193_s22 + $0x38] sm:$0xff]  ;;  %v233_v23 = vld [vmem:[%s1193_s22 + $0x40] sm:$0xff] }
  0x18   : > { %1055 = vmatpush3.bf16.msra.mxu0 %v1054_v13  ;;  %v1063_v22 = vpack.c.bf16 %v232_v21, %v231_v20  ;;  %v234_v24 = vld [vmem:[%s1193_s22 + $0x48] sm:$0xff]  ;;  %v235_v26 = vld [vmem:[%s1193_s22 + $0x50] sm:$0xff]  ;;  %v236_v27 = vld [vmem:[%s1193_s22 + $0x58] sm:$0xff] }
  0x19   : > { %1056 = vmatprep.subr.bf16.mxu0 %v1154_v12  ;;  %v1066_v25 = vpack.c.bf16 %v234_v24, %v233_v23  ;;  %v1069_v28 = vpack.c.bf16 %v236_v27, %v235_v26  ;;  %v237_v29 = vld [vmem:[%s1193_s22 + $0x60] sm:$0xff]  ;;  %v238_v30 = vld [vmem:[%s1193_s22 + $0x68] sm:$0xff]  ;;  %v239_v32 = vld [vmem:[%s1193_s22 + $0x70] sm:$0xff] }
  0x1a   : > { %v1072_v31 = vpack.c.bf16 %v238_v30, %v237_v29  ;;  %v240_v33 = vld [vmem:[%s1193_s22 + $0x78] sm:$0xff]  ;;  %v241_v35 = vld [vmem:[#allocation2] sm:$0xff]  ;;  %v313_v40 = vld [vmem:[%s1198_s25 + $0x8] sm:$0xff] }
  0x1b   : > { %v1075_v34 = vpack.c.bf16 %v240_v33, %v239_v32  ;;  %v312_v36 = vld [vmem:[%s1198_s25] sm:$0xff]  ;;  %v314_v41 = vld [vmem:[%s1198_s25 + $0x10] sm:$0xff]  ;;  %v315_v42 = vld [vmem:[%s1198_s25 + $0x18] sm:$0xff] }
  0x1c   : > { %1058 = vmatpush3.bf16.msra.mxu0 %v1057_v16  ;;  %996 = vmatprep.mubr.msk.f32.mxu1 %vm326_vm1, %v312_v36  ;;  %v879_v43 = vld [vmem:[%s1198_s25 + $0x20] sm:$0xff]  ;;  %v881_v44 = vld [vmem:[%s1198_s25 + $0x30] sm:$0xff]  ;;  %v880_v51 = vld [vmem:[%s1198_s25 + $0x28] sm:$0xff] }
  0x1d   : > { %1059 = vmatprep.subr.bf16.mxu0 %v1154_v12  ;;  %v882_v52 = vld [vmem:[%s1198_s25 + $0x38] sm:$0xff]  ;;  %v320_v55 = vld [vmem:[%s1376_s4 + $0x10] sm:$0xff]  ;;  %v319_v58 = vld [vmem:[%s1376_s4 + $0x8] sm:$0xff] }
  0x1e   : > { %v321_v54 = vld [vmem:[%s1376_s4 + $0x18] sm:$0xff]  ;;  %v318_v59 = vld [vmem:[%s1376_s4] sm:$0xff]  ;;  %v323_v4 = vld [vmem:[%s1376_s4 + $0x28] sm:$0xff] }
  0x1f   : > { %v322_v5 = vld [vmem:[%s1376_s4 + $0x20] sm:$0xff]  ;;  %v325_v10 = vld [vmem:[%s1376_s4 + $0x38] sm:$0xff]  ;;  %v324_v11 = vld [vmem:[%s1376_s4 + $0x30] sm:$0xff] }
  0x20   : > { %1061 = vmatpush3.bf16.msra.mxu0 %v1060_v19 }
  0x21   : > { %1062 = vmatprep.subr.bf16.mxu0 %v1154_v12 }
  0x24   : > { %1064 = vmatpush3.bf16.msra.mxu0 %v1063_v22 }
  0x25   : > { %1065 = vmatprep.subr.bf16.mxu0 %v1154_v12 }
  0x28   : > { %1067 = vmatpush3.bf16.msra.mxu0 %v1066_v25 }
  0x29   : > { %1068 = vmatprep.subr.bf16.mxu0 %v1154_v12 }
  0x2c   : > { %1070 = vmatpush3.bf16.msra.mxu0 %v1069_v28 }
  0x2d   : > { %1071 = vmatprep.subr.bf16.mxu0 %v1154_v12 }
  0x30   : > { %1073 = vmatpush3.bf16.msra.mxu0 %v1072_v31 }
  0x31   : > { %1074 = vmatprep.subr.bf16.mxu0 %v1154_v12 }
  0x34   : > { %1076 = vmatpush3.bf16.msra.mxu0 %v1075_v34 }
  0x37   : > { %984 = vmatmul.mubr.f32.vlgmr.msra.gmra.mrb[0].mxu0 %v241_v35 }
  0x38   : > { %988 = vmatprep.mubr.msk.f32.mxu0 %vm326_vm1, %v312_v36 }
 0x10a   : > { %v308_v37 = vpop.f32.mrb[0].mxu0 }
 0x10b   : > { %819 = vst [vmem:[#allocation2] sm:$0xff] %v308_v37  ;;  %v985_v38 = vpop.f32.mrb[1].mxu0  ;;  %986 = vmatprep.subr.msk.mxu0 %vm339_vm2, %v308_v37  ;;  %v317_v39 = vcombine.high %v308_v37, %v308_v37 }
 0x10c   : > { %987 = vmatpush3.msk.msra.mxu0 %vm339_vm2, %v308_v37 }
 0x10d   : > { %994 = vmatprep.subr.msk.mxu1 %vm339_vm2, %v317_v39  ;;  %989 = vmatmul.mubr.msk.f32.vlgmr.msra.gmra.mrb[2].mxu0 %vm326_vm1, %v313_v40 }
 0x10e   : > { %995 = vmatpush3.msk.msra.mxu1 %vm339_vm2, %v317_v39  ;;  %991 = vmatprep.mubr.msk.f32.mxu0 %vm326_vm1, %v314_v41 }
 0x10f   : > { %1077 = vmatprep.subr.bf16.mxu1 %v1154_v12  ;;  %997 = vmatmul.mubr.msk.f32.vlgmr.msra.gmra.mrb[0].mxu1 %vm326_vm1, %v313_v40 }
 0x110   : > { %1079 = vmatpush3.bf16.msra.mxu1 %v1054_v13  ;;  %999 = vmatprep.mubr.msk.f32.mxu1 %vm326_vm1, %v314_v41 }
 0x111   : > { %1080 = vmatprep.subr.bf16.mxu1 %v1154_v12  ;;  %992 = vmatmul.mubr.msk.f32.gmra.mrb[4].mxu0 %vm326_vm1, %v315_v42 }
 0x112   : > { %1039 = vmatprep.mubr.msk.f32.mxu0 %vm326_vm1, %v879_v43 }
 0x113   : > { %1000 = vmatmul.mubr.msk.f32.gmra.mrb[2].mxu1 %vm326_vm1, %v315_v42 }
 0x114   : > { %1082 = vmatpush3.bf16.msra.mxu1 %v1057_v16  ;;  %1034 = vmatprep.mubr.msk.f32.mxu1 %vm1155_vm0, %v1156_v15 }
 0x115   : > { %1083 = vmatprep.subr.bf16.mxu1 %v1154_v12 }
 0x118   : > { %1085 = vmatpush3.bf16.msra.mxu1 %v1060_v19 }
 0x119   : > { %1086 = vmatprep.subr.bf16.mxu1 %v1154_v12 }
 0x11c   : > { %1088 = vmatpush3.bf16.msra.mxu1 %v1063_v22 }
 0x11d   : > { %1089 = vmatprep.subr.bf16.mxu1 %v1154_v12 }
 0x120   : > { %1091 = vmatpush3.bf16.msra.mxu1 %v1066_v25 }
 0x121   : > { %1092 = vmatprep.subr.bf16.mxu1 %v1154_v12 }
 0x124   : > { %1094 = vmatpush3.bf16.msra.mxu1 %v1069_v28 }
 0x125   : > { %1095 = vmatprep.subr.bf16.mxu1 %v1154_v12 }
 0x128   : > { %1097 = vmatpush3.bf16.msra.mxu1 %v1072_v31 }
 0x129   : > { %1098 = vmatprep.subr.bf16.mxu1 %v1154_v12 }
 0x12c   : > { %1100 = vmatpush3.bf16.msra.mxu1 %v1075_v34 }
 0x12f   : > { %1035 = vmatmul.mubr.f32.vlgmr.msra.gmra.mrb[4].mxu1 %v308_v37 }
 0x130   : > { %1042 = vmatprep.mubr.msk.f32.mxu1 %vm326_vm1, %v881_v44 }
 0x1e4   : > { %v993_v45 = vpop.f32.mrb[4].mxu0 }
 0x1e5   : > { %v418_v46 = vpop.f32.mrb[5].mxu0  ;;  %v517_v56 = vadd.f32 %v993_v45, %v321_v54 }
 0x1e6   : > { %v516_v57 = vadd.f32 %v418_v46, %v320_v55 }
 0x202   : > { %v596_v47 = vpop.f32.mrb[4].mxu1 }
 0x203   : > { %v600_v48 = vmul.f32 2.0, %v596_v47  ;;  %v1036_v49 = vpop.f32.mrb[5].mxu1 }
 0x205   : > { %v601_v50 = vsub.f32 %v600_v48, %v241_v35 }
 0x207   : > { %1037 = vmatprep.subr.msk.mxu0 %vm339_vm2, %v601_v50  ;;  %1101 = vmatprep.subr.msk.mxu1 %vm339_vm2, %v601_v50  ;;  %v608_v53 = vcombine.high %v601_v50, %v601_v50 }
 0x208   : > { %1038 = vmatpush3.msk.msra.mxu0 %vm339_vm2, %v601_v50  ;;  %1102 = vmatpush3.msk.msra.mxu1 %vm339_vm2, %v601_v50 }
 0x209   : > { %1040 = vmatmul.mubr.msk.f32.vlgmr.msra.gmra.mrb[2].mxu0 %vm326_vm1, %v880_v51  ;;  %1043 = vmatmul.mubr.msk.f32.vlgmr.msra.gmra.mrb[6].mxu1 %vm326_vm1, %v882_v52 }
 0x20a   : > { %1045 = vmatprep.subr.msk.mxu1 %vm339_vm2, %v608_v53  ;;  %1047 = vmatprep.mubr.msk.f32.mxu1 %vm326_vm1, %v879_v43 }
 0x20b   : > { %1046 = vmatpush3.msk.msra.mxu1 %vm339_vm2, %v608_v53 }
 0x20d   : > { %1048 = vmatmul.mubr.msk.f32.vlgmr.msra.gmra.mrb[0].mxu1 %vm326_vm1, %v880_v51 }
 0x20e   : > { %1050 = vmatprep.mubr.msk.f32.mxu1 %vm326_vm1, %v881_v44 }
 0x211   : > { %1051 = vmatmul.mubr.msk.f32.gmra.mrb[2].mxu1 %vm326_vm1, %v882_v52 }
 0x2dc   : > { %v1041_v60 = vpop.f32.mrb[2].mxu0  ;;  %v1044_v61 = vpop.f32.mrb[6].mxu1 }
 0x2dd   : > { %v1105_v62 = vadd.f32 %v1041_v60, %v319_v58  ;;  %v697_v63 = vpop.f32.mrb[3].mxu0  ;;  %v1112_v0 = vadd.f32 %v1044_v61, %v517_v56  ;;  %v707_v1 = vpop.f32.mrb[7].mxu1 }
 0x2de   : > { %v1108_v2 = vadd.f32 %v697_v63, %v318_v59  ;;  %v1116_v3 = vadd.f32 %v707_v1, %v516_v57 }
 0x2df   : > { %812 = vst [vmem:[%s1376_s4 + $0x8] sm:$0xff] %v1105_v62  ;;  %814 = vst [vmem:[%s1376_s4 + $0x18] sm:$0xff] %v1112_v0 }
 0x2e0   : > { %811 = vst [vmem:[%s1376_s4] sm:$0xff] %v1108_v2  ;;  %813 = vst [vmem:[%s1376_s4 + $0x10] sm:$0xff] %v1116_v3  ;;  %v1049_v6 = vpop.f32.mrb[0].mxu1 }
 0x2e1   : > { %v1119_v7 = vadd.f32 %v1049_v6, %v323_v4  ;;  %v784_v8 = vpop.f32.mrb[1].mxu1 }
 0x2e2   : > { %v1122_v9 = vadd.f32 %v784_v8, %v322_v5 }
 0x2e3   : > { %816 = vst [vmem:[%s1376_s4 + $0x28] sm:$0xff] %v1119_v7 }
 0x2e4   : > { %815 = vst [vmem:[%s1376_s4 + $0x20] sm:$0xff] %v1122_v9  ;;  %v1052_v12 = vpop.f32.mrb[2].mxu1 }
 0x2e5   : > { %v1125_v13 = vadd.f32 %v1052_v12, %v325_v10  ;;  %v794_v14 = vpop.f32.mrb[3].mxu1 }
 0x2e6   : > { %v1128_v15 = vadd.f32 %v794_v14, %v324_v11 }
 0x2e7   : > { %818 = vst [vmem:[%s1376_s4 + $0x38] sm:$0xff] %v1125_v13 }
 0x2e8   : > { %817 = vst [vmem:[%s1376_s4 + $0x30] sm:$0xff] %v1128_v15 }
 0x2e9 PF: > { %s14_s15 = sadd.s32 1, %s1152_s15  }
 0x2ea   : > { %p11_p5 = scmp.ge.s32.totalorder %s14_s15, 4  }
 0x2ec   :  { %13 = sbr.rel (!%p11_p5) target bundleno = 1 (0x1), region = 70 }

</bundles_post_ra>
